<compile_context>
chip_gen: v6e
topology: v6e:2x2x1
jax: 0.10.0
libtpu: 0.0.40
codegen_flags: <defaults>
</compile_context>

<pallas_src>
import functools

import jax
import jax.numpy as jnp
from jax import lax
from jax.experimental import pallas as pl
from jax.experimental.pallas import tpu as pltpu

TEMP = 0.05    # self.temp in the module
RATIO = 0.8    # opt.ratio (deterministic synthetic config value)

_PAD_NEG = -1.0e9          # sims_local value for pad rows/cols -> exp() == 0
_SINGLE_TILE_MAX = 512     # below this, one (padded) tile covers the batch


def _round_up(x, m):
    return ((x + m - 1) // m) * m


def _choose_tiles(batch):
    """Square (t x t) logits tiles; returns (padded_batch, t)."""
    if batch <= _SINGLE_TILE_MAX:
        bp = _round_up(batch, 8)
        return bp, bp
    for t in (512, 256, 128):            # biggest tile with <= 25% padding
        bp = _round_up(batch, t)
        if bp * 4 <= batch * 5:
            return bp, t
    return _round_up(batch, 128), 128


def _vmem_limit_bytes(tr, tc, d):
    inputs = 2 * (tr * d * 2 + tc * d * 2 + tr * tc * 4)   # double-buffered
    work = 6 * tr * tc * 4                                 # f32 intermediates
    outs = 4 * (tr + 2 * tc) * 4
    need = inputs + work + outs + (4 << 20)
    return int(min(max(need, 32 << 20), 56 << 20))         # <= 56 MiB: v7x-safe


def _ntxent_tile_kernel(tr, tc, c_local, c_global,
                        im_ref, s_ref, simsl_ref, row_ref, col_ref, diag_ref):
    r = pl.program_id(0)
    c = pl.program_id(1)

    # Blended, temperature-scaled logits for this (tr, tc) tile.  im/s arrive
    # as bf16 (cast once in the wrapper); the MXU accumulates in f32 and the
    # contraction is over the embedding axis of BOTH operands (no s.T relayout
    # in VMEM).
    scores = lax.dot_general(
        im_ref[...], s_ref[...],
        dimension_numbers=(((1,), (1,)), ((), ())),
        preferred_element_type=jnp.float32)                     # (tr, tc)
    logits = c_local * simsl_ref[...] + c_global * scores       # (tr, tc)

    # Row (i2t) partial logsumexp over this tile's columns — one exp pass.
    rmax = jnp.max(logits, axis=1, keepdims=True)               # (tr, 1)
    p = jnp.exp(logits - rmax)                                  # (tr, tc)
    row_part = rmax + jnp.log(jnp.sum(p, axis=1, keepdims=True))
    row_ref[...] = row_part[None]                               # (1, tr, 1)

    # Column (t2i) partial logsumexp re-uses the SAME exp tile:
    #   p[i, j] * exp(rmax[i] - g) == exp(logits[i, j] - g),  g = tile max,
    # so nothing overflows.  (Underflow to -inf only if an entire column sits
    # > ~88 below the tile max — impossible for bounded cosine-like sims at
    # temp = 0.05; documented assumption.)
    g = jnp.max(rmax, axis=0, keepdims=True)                    # (1, 1)
    w = jnp.exp(rmax - g)                                       # (tr, 1)
    col_part = g + jnp.log(jnp.sum(p * w, axis=0, keepdims=True))
    col_ref[...] = col_part[None]                               # (1, 1, tc)

    # Diagonal (positives): only tiles intersecting the global diagonal do any
    # mask work.  (row_global == col_global) <=> (j - i) == r*tr - c*tc, so a
    # single constant iota-difference pattern vs. one scalar offset suffices.
    on_diag = jnp.logical_and(r * tr < (c + 1) * tc, c * tc < (r + 1) * tr)

    @pl.when(on_diag)
    def _():
        dd = (lax.broadcasted_iota(jnp.int32, (tr, tc), 1)
              - lax.broadcasted_iota(jnp.int32, (tr, tc), 0))
        dvals = jnp.where(dd == (r * tr - c * tc), logits, 0.0)
        diag_ref[...] = jnp.sum(dvals, axis=0, keepdims=True)[None]

    @pl.when(jnp.logical_not(on_diag))
    def _():
        diag_ref[...] = jnp.zeros_like(diag_ref)


@functools.partial(jax.jit, static_argnames=("ratio", "temp"))
def ntxent_loss_v2(im, s, sims_local, *, ratio=RATIO, temp=TEMP):
    """im: [B, D], s: [B, D], sims_local: [B, B] -> scalar f32 loss."""
    B, D = im.shape
    Bp, t = _choose_tiles(B)
    tr = tc = t
    R, C = Bp // tr, Bp // tc

    # bf16 MXU operands (halves the dominant HBM stream); sims_local stays f32
    # (read exactly once, keeps the heavily-weighted local term precise).
    im_bf = im.astype(jnp.bfloat16)
    s_bf = s.astype(jnp.bfloat16)
    sims = sims_local.astype(jnp.float32)
    if Bp != B:
        pad = Bp - B
        im_bf = jnp.pad(im_bf, ((0, pad), (0, 0)))
        s_bf = jnp.pad(s_bf, ((0, pad), (0, 0)))
        sims = jnp.pad(sims, ((0, pad), (0, pad)), constant_values=_PAD_NEG)

    c_local = float(ratio) / float(temp)
    c_global = (1.0 - float(ratio)) / float(temp)
    kernel = functools.partial(_ntxent_tile_kernel, tr, tc, c_local, c_global)

    hbm_bytes = ((R + 1) * Bp * D * 2          # bf16 s re-stream + im
                 + Bp * Bp * 4                 # sims_local, read once
                 + (C + 2 * R) * Bp * 4)       # partial outputs

    out_row, out_col, out_diag = pl.pallas_call(
        kernel,
        grid=(R, C),
        in_specs=[
            pl.BlockSpec((tr, D), lambda r, c: (r, 0)),     # im row tile
            pl.BlockSpec((tc, D), lambda r, c: (c, 0)),     # s col tile
            pl.BlockSpec((tr, tc), lambda r, c: (r, c)),    # sims_local tile
        ],
        out_shape=(
            jax.ShapeDtypeStruct((C, Bp, 1), jnp.float32),  # row-lse partials
            jax.ShapeDtypeStruct((R, 1, Bp), jnp.float32),  # col-lse partials
            jax.ShapeDtypeStruct((R, 1, Bp), jnp.float32),  # diagonal partials
        ),
        out_specs=(
            pl.BlockSpec((1, tr, 1), lambda r, c: (c, r, 0)),
            pl.BlockSpec((1, 1, tc), lambda r, c: (r, 0, c)),
            pl.BlockSpec((1, 1, tc), lambda r, c: (r, 0, c)),
        ),
        compiler_params=pltpu.CompilerParams(
            dimension_semantics=("parallel", "parallel"),
            vmem_limit_bytes=_vmem_limit_bytes(tr, tc, D)),
        cost_estimate=pl.CostEstimate(
            flops=2 * Bp * Bp * D,
            transcendentals=Bp * Bp,
            bytes_accessed=hbm_bytes),
    )(im_bf, s_bf, sims)

    # Tiny O(B * num_tiles) epilogue; pad rows/cols are sliced away.  By
    # linearity of the mean: loss = (sum(row_lse) + sum(col_lse) - 2*sum(diag)) / B.
    row_lse = jax.nn.logsumexp(out_row[:, :B, 0], axis=0)    # (B,)
    col_lse = jax.nn.logsumexp(out_col[:, 0, :B], axis=0)    # (B,)
    diag = jnp.sum(out_diag[:, 0, :B], axis=0)               # (B,)
    return (jnp.sum(row_lse) + jnp.sum(col_lse) - 2.0 * jnp.sum(diag)) / B


def _reference(im, s, sims_local, ratio, temp):
    sim = ratio * sims_local + (1.0 - ratio) * (im @ s.T)
    logits = sim / temp
    diag = jnp.diag(logits)
    li2t = jnp.mean(jax.nn.logsumexp(logits, axis=1) - diag)
    lt2i = jnp.mean(jax.nn.logsumexp(logits, axis=0) - diag)
    return li2t + lt2i


if __name__ == "__main__":
    D = 32
    key = jax.random.PRNGKey(0)
    # B=8 exercises the aligned path; B=6 exercises the padded-batch path
    # (the repaired _pick_tile fallback).
    for B in (8, 6):
        k1, k2, k3 = jax.random.split(jax.random.fold_in(key, B), 3)
        # L2-normalized embeddings (as a cosine-sim loss would receive).
        im = jax.random.normal(k1, (B, D), dtype=jnp.float32)
        im = im / jnp.linalg.norm(im, axis=1, keepdims=True)
        s = jax.random.normal(k2, (B, D), dtype=jnp.float32)
        s = s / jnp.linalg.norm(s, axis=1, keepdims=True)
        sims_local = jax.random.normal(k3, (B, B), dtype=jnp.float32) * 0.1

        loss = jax.block_until_ready(
            ntxent_loss_v2(im, s, sims_local, ratio=RATIO, temp=TEMP))
        ref = jax.block_until_ready(_reference(im, s, sims_local, RATIO, TEMP))
        # bf16 MXU inputs (f32 accumulation) -> tolerance commensurate w/ bf16.
        assert jnp.allclose(loss, ref, rtol=2e-2, atol=2e-2), (B, loss, ref)
    print("KERNEL_OK")
</pallas_src>

<mosaic_0001>
module attributes {stable_mosaic.version = 11 : i64} {
  func.func @_ntxent_tile_kernel(%arg0: i32, %arg1: i32, %arg2: memref<8x32xbf16, #tpu.memory_space<vmem>>, %arg3: memref<8x32xbf16, #tpu.memory_space<vmem>>, %arg4: memref<8x8xf32, #tpu.memory_space<vmem>>, %arg5: memref<1x8x1xf32, #tpu.memory_space<vmem>>, %arg6: memref<1x1x8xf32, #tpu.memory_space<vmem>>, %arg7: memref<1x1x8xf32, #tpu.memory_space<vmem>>) attributes {dimension_semantics = [#tpu.dimension_semantics<parallel>, #tpu.dimension_semantics<parallel>], iteration_bounds = array<i64: 1, 1>, scalar_prefetch = 0 : i64, scratch_operands = 0 : i64, tpu.core_type = #tpu.core_type<tc>, window_params = [{transform_indices = @transform_0, window_bounds = array<i64: 8, 32>}, {transform_indices = @transform_1, window_bounds = array<i64: 8, 32>}, {transform_indices = @transform_2, window_bounds = array<i64: 8, 8>}, {transform_indices = @transform_3, window_bounds = array<i64: 1, 8, 1>}, {transform_indices = @transform_4, window_bounds = array<i64: 1, 1, 8>}, {transform_indices = @transform_5, window_bounds = array<i64: 1, 1, 8>}]} {
    %c0 = arith.constant 0 : index
    %c0_0 = arith.constant 0 : index
    %0 = vector.load %arg2[%c0, %c0_0] : memref<8x32xbf16, #tpu.memory_space<vmem>>, vector<8x32xbf16>
    %c0_1 = arith.constant 0 : index
    %c0_2 = arith.constant 0 : index
    %1 = vector.load %arg3[%c0_1, %c0_2] : memref<8x32xbf16, #tpu.memory_space<vmem>>, vector<8x32xbf16>
    %cst = arith.constant dense<0.000000e+00> : vector<8x8xf32>
    %2 = tpu.matmul %0, %1, %cst {dimension_numbers = #tpu.dot_dimension_numbers<[1], [1], [0], [0], [0, 0, 1, 0], [], []>} : vector<8x32xbf16>, vector<8x32xbf16>, vector<8x8xf32> -> vector<8x8xf32>
    %c0_3 = arith.constant 0 : index
    %c0_4 = arith.constant 0 : index
    %3 = vector.load %arg4[%c0_3, %c0_4] : memref<8x8xf32, #tpu.memory_space<vmem>>, vector<8x8xf32>
    %cst_5 = arith.constant 1.600000e+01 : f32
    %4 = vector.broadcast %cst_5 : f32 to vector<8x8xf32>
    %5 = arith.mulf %4, %3 : vector<8x8xf32>
    %cst_6 = arith.constant 4.000000e+00 : f32
    %6 = vector.broadcast %cst_6 : f32 to vector<8x8xf32>
    %7 = arith.mulf %6, %2 : vector<8x8xf32>
    %8 = arith.addf %5, %7 : vector<8x8xf32>
    %cst_7 = arith.constant dense<0xFF800000> : vector<8xf32>
    %9 = vector.multi_reduction <maximumf>, %8, %cst_7 [1] : vector<8x8xf32> to vector<8xf32>
    %10 = vector.shape_cast %9 : vector<8xf32> to vector<8x1xf32>
    %11 = vector.broadcast %10 : vector<8x1xf32> to vector<8x8xf32>
    %12 = arith.subf %8, %11 : vector<8x8xf32>
    %13 = math.exp %12 : vector<8x8xf32>
    %cst_8 = arith.constant dense<0.000000e+00> : vector<8xf32>
    %14 = vector.multi_reduction <add>, %13, %cst_8 [1] : vector<8x8xf32> to vector<8xf32>
    %15 = vector.shape_cast %14 : vector<8xf32> to vector<8x1xf32>
    %16 = math.log %15 : vector<8x1xf32>
    %17 = arith.addf %10, %16 : vector<8x1xf32>
    %18 = vector.shape_cast %17 : vector<8x1xf32> to vector<1x8x1xf32>
    %c0_9 = arith.constant 0 : index
    %c0_10 = arith.constant 0 : index
    %c0_11 = arith.constant 0 : index
    %19 = vector.load %arg5[%c0_9, %c0_10, %c0_11] : memref<1x8x1xf32, #tpu.memory_space<vmem>>, vector<1x8x1xf32>
    tpu.vector_store %arg5[%c0_9, %c0_10, %c0_11], %18 {strides = array<i32>} : memref<1x8x1xf32, #tpu.memory_space<vmem>>, vector<1x8x1xf32>,
    %cst_12 = arith.constant dense<0xFF800000> : vector<1xf32>
    %20 = vector.multi_reduction <maximumf>, %10, %cst_12 [0] : vector<8x1xf32> to vector<1xf32>
    %21 = vector.shape_cast %20 : vector<1xf32> to vector<1x1xf32>
    %22 = vector.broadcast %21 : vector<1x1xf32> to vector<8x1xf32>
    %23 = arith.subf %10, %22 : vector<8x1xf32>
    %24 = math.exp %23 : vector<8x1xf32>
    %25 = vector.broadcast %24 : vector<8x1xf32> to vector<8x8xf32>
    %26 = arith.mulf %13, %25 : vector<8x8xf32>
    %cst_13 = arith.constant dense<0.000000e+00> : vector<8xf32>
    %27 = vector.multi_reduction <add>, %26, %cst_13 [0] : vector<8x8xf32> to vector<8xf32>
    %28 = vector.shape_cast %27 : vector<8xf32> to vector<1x8xf32>
    %29 = math.log %28 : vector<1x8xf32>
    %30 = vector.broadcast %21 : vector<1x1xf32> to vector<1x8xf32>
    %31 = arith.addf %30, %29 : vector<1x8xf32>
    %32 = vector.shape_cast %31 : vector<1x8xf32> to vector<1x1x8xf32>
    %c0_14 = arith.constant 0 : index
    %c0_15 = arith.constant 0 : index
    %c0_16 = arith.constant 0 : index
    %33 = vector.load %arg6[%c0_14, %c0_15, %c0_16] : memref<1x1x8xf32, #tpu.memory_space<vmem>>, vector<1x1x8xf32>
    tpu.vector_store %arg6[%c0_14, %c0_15, %c0_16], %32 {strides = array<i32>} : memref<1x1x8xf32, #tpu.memory_space<vmem>>, vector<1x1x8xf32>,
    %c8_i32 = arith.constant 8 : i32
    %34 = arith.muli %arg0, %c8_i32 : i32
    %c1_i32 = arith.constant 1 : i32
    %35 = arith.addi %arg1, %c1_i32 : i32
    %c8_i32_17 = arith.constant 8 : i32
    %36 = arith.muli %35, %c8_i32_17 : i32
    %37 = arith.cmpi slt, %34, %36 : i32
    %c8_i32_18 = arith.constant 8 : i32
    %38 = arith.muli %arg1, %c8_i32_18 : i32
    %c1_i32_19 = arith.constant 1 : i32
    %39 = arith.addi %arg0, %c1_i32_19 : i32
    %c8_i32_20 = arith.constant 8 : i32
    %40 = arith.muli %39, %c8_i32_20 : i32
    %41 = arith.cmpi slt, %38, %40 : i32
    %42 = arith.andi %37, %41 : i1
    %43 = arith.extui %42 : i1 to i32
    %c0_i32 = arith.constant 0 : i32
    %44 = arith.cmpi ne, %43, %c0_i32 : i32
    scf.if %44 {
      %48 = tpu.iota {dimensions = array<i32: 1>} : vector<8x8xi32>
      %49 = tpu.iota {dimensions = array<i32: 0>} : vector<8x8xi32>
      %50 = arith.subi %48, %49 : vector<8x8xi32>
      %c8_i32_22 = arith.constant 8 : i32
      %51 = arith.muli %arg0, %c8_i32_22 : i32
      %c8_i32_23 = arith.constant 8 : i32
      %52 = arith.muli %arg1, %c8_i32_23 : i32
      %53 = arith.subi %51, %52 : i32
      %54 = vector.broadcast %53 : i32 to vector<8x8xi32>
      %55 = arith.cmpi eq, %50, %54 : vector<8x8xi32>
      %cst_24 = arith.constant 0.000000e+00 : f32
      %56 = vector.broadcast %cst_24 : f32 to vector<8x8xf32>
      %57 = arith.select %55, %8, %56 : vector<8x8xi1>, vector<8x8xf32>
      %cst_25 = arith.constant dense<0.000000e+00> : vector<8xf32>
      %58 = vector.multi_reduction <add>, %57, %cst_25 [0] : vector<8x8xf32> to vector<8xf32>
      %59 = vector.shape_cast %58 : vector<8xf32> to vector<1x8xf32>
      %60 = vector.shape_cast %59 : vector<1x8xf32> to vector<1x1x8xf32>
      %c0_26 = arith.constant 0 : index
      %c0_27 = arith.constant 0 : index
      %c0_28 = arith.constant 0 : index
      %61 = vector.load %arg7[%c0_26, %c0_27, %c0_28] : memref<1x1x8xf32, #tpu.memory_space<vmem>>, vector<1x1x8xf32>
      tpu.vector_store %arg7[%c0_26, %c0_27, %c0_28], %60 {strides = array<i32>} : memref<1x1x8xf32, #tpu.memory_space<vmem>>, vector<1x1x8xf32>,
    } else {
    }
    %true = arith.constant true
    %45 = arith.xori %42, %true : i1
    %46 = arith.extui %45 : i1 to i32
    %c0_i32_21 = arith.constant 0 : i32
    %47 = arith.cmpi ne, %46, %c0_i32_21 : i32
    scf.if %47 {
      %cst_22 = arith.constant 0.000000e+00 : f32
      %48 = vector.broadcast %cst_22 : f32 to vector<1x1x8xf32>
      %c0_23 = arith.constant 0 : index
      %c0_24 = arith.constant 0 : index
      %c0_25 = arith.constant 0 : index
      %49 = vector.load %arg7[%c0_23, %c0_24, %c0_25] : memref<1x1x8xf32, #tpu.memory_space<vmem>>, vector<1x1x8xf32>
      tpu.vector_store %arg7[%c0_23, %c0_24, %c0_25], %48 {strides = array<i32>} : memref<1x1x8xf32, #tpu.memory_space<vmem>>, vector<1x1x8xf32>,
    } else {
    }
    return
  }
  func.func @transform_0(%arg0: i32, %arg1: i32) -> (i32, i32) {
    %c0_i32 = arith.constant 0 : i32
    %c0_i32_0 = arith.constant 0 : i32
    return %arg0, %c0_i32 : i32, i32
  }
  func.func @transform_1(%arg0: i32, %arg1: i32) -> (i32, i32) {
    %c0_i32 = arith.constant 0 : i32
    %c0_i32_0 = arith.constant 0 : i32
    return %arg1, %c0_i32 : i32, i32
  }
  func.func @transform_2(%arg0: i32, %arg1: i32) -> (i32, i32) {
    %c0_i32 = arith.constant 0 : i32
    return %arg0, %arg1 : i32, i32
  }
  func.func @transform_3(%arg0: i32, %arg1: i32) -> (i32, i32, i32) {
    %c0_i32 = arith.constant 0 : i32
    %c0_i32_0 = arith.constant 0 : i32
    return %arg1, %arg0, %c0_i32 : i32, i32, i32
  }
  func.func @transform_4(%arg0: i32, %arg1: i32) -> (i32, i32, i32) {
    %c0_i32 = arith.constant 0 : i32
    %c0_i32_0 = arith.constant 0 : i32
    return %arg0, %c0_i32, %arg1 : i32, i32, i32
  }
  func.func @transform_5(%arg0: i32, %arg1: i32) -> (i32, i32, i32) {
    %c0_i32 = arith.constant 0 : i32
    %c0_i32_0 = arith.constant 0 : i32
    return %arg0, %c0_i32, %arg1 : i32, i32, i32
  }
}

</mosaic_0001>

<bundles_post_ra>
// kernel: ntxent_loss_v2.1
= control target key start
LH: loop header
LB: loop body
LE: loop exit
PB: predicated region body
PF: predicated region fallthrough
CT: control target
= control target key end

     0   :  { %vm20_vm0 = vcmask 261120   ;;  %v172_v0 = vmov 0.0   ;;  %vm173_vm1 = vmmov 0   ;;  %v120_v4 = vlaneseq  ;;  %s228_s1 = inlined_call_operand.vmem [shape: bf16[8,32], index: 1, kind: input, shape index: {}]   ;;  %s229_s0 = inlined_call_operand.vmem [shape: bf16[8,32], index: 0, kind: input, shape index: {}]   ;;  %s230_s2 = inlined_call_operand.vmem [shape: f32[8,8], index: 2, kind: input, shape index: {}]   ;;  %s231_s5 = inlined_call_operand.vmem [shape: f32[1,1,8], index: 5, kind: output, shape index: {2}]   ;;  %s232_s4 = inlined_call_operand.vmem [shape: f32[1,1,8], index: 4, kind: output, shape index: {1}]   ;;  %s233_s3 = inlined_call_operand.vmem [shape: f32[1,8,1], index: 3, kind: output, shape index: {0}]  }
   0x1   :  { %156 = vmatprep.subr.bf16.mxu0 %v172_v0  ;;  %v19_v1 = vld [vmem:[%s228_s1] sm:$0xf]  ;;  %158 = vmatprep.mubr.msk.bf16.mxu0 %vm173_vm1, %v172_v0  ;;  %vm71_vm3 = vcmask 64512   ;;  %vm106_vm4 = vcmask 57344   ;;  %vm84_vm5 = vcmask 7168  }
   0x2   :  { %v25_v2 = vsel %vm20_vm0, %v19_v1, 0  ;;  %v18_v3 = vld [vmem:[%s229_s0] sm:$0xf]  ;;  %v121_v5 = vand.u32 127, %v120_v4  ;;  %v123_v6 = vshrl.u32 %v120_v4, 7 }
   0x3   :  { %157 = vmatpush3.bf16.xpose.msra.mxu0 %v25_v2  ;;  %v67_v7 = vld [vmem:[%s230_s2] sm:$0xff] }
   0x4   :  { %v124_v8 = vsub.s32 %v121_v5, %v123_v6  ;;  %v68_v9 = vmul.f32 16.0, %v67_v7 }
   0x6   :  { %vm127_vm2 = vcmp.eq.s32.totalorder %v124_v8, 0 }
   0xa   :  { %159 = vmatmul.mubr.msk.bf16.vlgmr.msra.gmra.mxu0 %vm20_vm0, %v18_v3 }
  0xca   :  { %v61_v10 = vpop.f32.mrf.mxu0 }
  0xcb   :  { %v69_v11 = vmul.f32 4.0, %v61_v10 }
  0xcc   :  { %v160_v12 = vpop.f32.mrf.mxu0 }
  0xcd   :  { %v70_v13 = vadd.f32 %v69_v11, %v68_v9 }
  0xce   :  { %v64_v14 = vpop.f32.mrf.mxu0 }
  0xcf   :  { %v128_v15 = vsel %vm127_vm2, %v70_v13, 0.0  ;;  %v72_v16 = vsel %vm71_vm3, %v70_v13, -inf }
  0xd0   :  { %v129_v17 = vsel %vm71_vm3, %v128_v15, 0.0  ;;  %73 = vmax.xlane.f32.xlu0 %v72_v16  ;;  %v161_v18 = vpop.f32.mrf.mxu0 }
  0xd1   :  { %v130_v19 = vrot.slane %v129_v17, 4 }
  0xd3   :  { %v131_v20 = vadd.f32 %v130_v19, %v129_v17 }
  0xd5   :  { %v132_v21 = vrot.slane %v131_v20, 2 }
  0xd7   :  { %v133_v22 = vadd.f32 %v132_v21, %v131_v20 }
  0xd9   :  { %v134_v23 = vrot.slane %v133_v22, 1 }
  0xdb   :  { %v135_v24 = vadd.f32 %v134_v23, %v133_v22 }
  0xdd   :  { %136 = vst.msk [vmem:[%s231_s5] sm:$0x1] %vm106_vm4, %v135_v24 }
 0x159   :  { %v74_v25 = vpop.xlane.xlu0 %73 }
 0x15a   :  { %v75_v26 = vsub.f32 %v70_v13, %v74_v25  ;;  %v86_v27 = vrot.slane %v74_v25, 4 }
 0x15c   :  { %v76_v28 = vmul.f32 1.442695, %v75_v26  ;;  %v87_v29 = vmax.f32 %v74_v25, %v86_v27 }
 0x15e   :  { %164 = vpow2.f32 %v76_v28  ;;  %v88_v30 = vrot.slane %v87_v29, 2 }
 0x160   :  { %v89_v31 = vmax.f32 %v87_v29, %v88_v30 }
 0x162   :  { %v90_v32 = vrot.slane %v89_v31, 1 }
 0x164   :  { %v91_v33 = vmax.f32 %v89_v31, %v90_v32 }
 0x166   :  { %v92_v34 = vsub.f32 %v74_v25, %v91_v33 }
 0x168   :  { %v93_v35 = vmul.f32 1.442695, %v92_v34 }
 0x16a   :  { %166 = vpow2.f32 %v93_v35 }
 0x16b   :  { %v165_v36 = vpop.eup %164 }
 0x16c   :  { %v78_v37 = vsel %vm71_vm3, %v165_v36, 0.0 }
 0x16d   :  { %79 = vadd.xlane.f32.xlu0 %v78_v37 }
 0x177   :  { %v167_v38 = vpop.eup %166 }
 0x178   :  { %v95_v39 = vmul.f32 %v167_v38, %v165_v36 }
 0x17a   :  { %v96_v40 = vsel %vm71_vm3, %v95_v39, 0.0 }
 0x17b   :  { %v97_v41 = vrot.slane %v96_v40, 4 }
 0x17d   :  { %v98_v42 = vadd.f32 %v97_v41, %v96_v40 }
 0x17f   :  { %v99_v43 = vrot.slane %v98_v42, 2 }
 0x181   :  { %v100_v44 = vadd.f32 %v99_v43, %v98_v42 }
 0x183   :  { %v101_v45 = vrot.slane %v100_v44, 1 }
 0x185   :  { %v102_v46 = vadd.f32 %v101_v45, %v100_v44 }
 0x187   :  { %168 = vlog2.f32 %v102_v46 }
 0x194   :  { %v169_v47 = vpop.eup %168 }
 0x195   :  { %v104_v48 = vmul.f32 0.6931472, %v169_v47 }
 0x197   :  { %v105_v49 = vadd.f32 %v104_v48, %v91_v33 }
 0x199   :  { %107 = vst.msk [vmem:[%s232_s4] sm:$0x1] %vm106_vm4, %v105_v49 }
 0x1f6   :  { %v80_v50 = vpop.xlane.xlu0 %79 }
 0x1f7   :  { %170 = vlog2.f32 %v80_v50 }
 0x204   :  { %v171_v51 = vpop.eup %170 }
 0x205   :  { %v82_v52 = vmul.f32 0.6931472, %v171_v51 }
 0x207   :  { %v83_v53 = vadd.f32 %v82_v52, %v74_v25 }
 0x209   :  { %85 = vst.msk [vmem:[%s233_s3] sm:$0xff] %vm84_vm5, %v83_v53 }

</bundles_post_ra>
